<compile_context>
chip_gen: v5e
topology: v5e:2x2
jax: 0.10.0
libtpu: 0.0.40
codegen_flags: <defaults>
</compile_context>

<pallas_src>
import jax
import jax.numpy as jnp
from jax import lax
from jax.experimental import pallas as pl
from jax.experimental.pallas import tpu as pltpu


# Total bytes allowed for the double-buffered streamed blocks of one grid step
# (i.e. ~8 MiB per buffer): big enough to reach ~85%+ of HBM roofline on
# v5e/v6e/v7x while staying far under the scoped-VMEM limits below.
_TILE_BUDGET_BYTES = 16 * 1024 * 1024


def _vmem_limit_bytes():
    """Generation-aware scoped-VMEM limit: v7x has 64 MiB physical -> cap at
    48 MiB; v5e/v6e have 128 MiB -> 64 MiB.  Conservative fallback otherwise."""
    try:
        kind = jax.devices()[0].device_kind.lower()
    except Exception:
        return 32 * 1024 * 1024
    if "v7" in kind:
        return 48 * 1024 * 1024
    if "tpu" in kind or kind.startswith("v"):
        return 64 * 1024 * 1024
    return 32 * 1024 * 1024


def _pick_tile(n, bytes_per_row, *, align, max_tile, min_steps=2):
    """Largest tile that divides n, is `align`-sublane aligned, keeps the
    double-buffered streamed block under _TILE_BUDGET_BYTES and (when possible)
    leaves >= min_steps grid steps so both v7x TensorCores get work."""
    if n % align != 0:
        return n  # defensive; callers pad n to a multiple of `align`
    tile = align
    while True:
        nxt = tile * 2
        if nxt > max_tile or nxt > n or n % nxt != 0:
            break
        if nxt * bytes_per_row * 2 > _TILE_BUDGET_BYTES:   # x2 double buffering
            break
        if n // nxt < min_steps:
            break
        tile = nxt
    return tile


def _pick_col_tile(batch, max_col_tile):
    """Column tile for stage 2: full B when small (lane-dense single block),
    else the largest multiple-of-128 divisor <= max_col_tile."""
    if batch <= max_col_tile or batch % 128 != 0:
        return batch
    tn = 128
    while tn * 2 <= max_col_tile and batch % (tn * 2) == 0:
        tn *= 2
    return tn


# -------- stage 1: seq pool -> linear (MXU) -> L2 normalize (rsqrt on EUP) -------- #
def _encode_kernel(feat_ref, w_ref, z_ref):
    # feat_ref: (tb, S, H)  feature tile (bf16 or f32)
    # w_ref   : (H, E)      projection weight, bias=False (mxu dtype)
    # z_ref   : (tb, E)     L2-normalized embeddings (emb dtype)
    seq = feat_ref.shape[1]
    # Sum-pool over seq via per-slab accumulation: only the (tb, H) accumulator
    # plus one slab stays live (no materialized (tb, S, H) f32 temporary, no
    # cross-sublane XLU reduce).  The 1/S mean factor is dropped: it cancels
    # under the L2 normalization below.
    pooled = feat_ref[:, 0, :].astype(jnp.float32)
    for s in range(1, seq):
        pooled = pooled + feat_ref[:, s, :].astype(jnp.float32)
    # Projection on the MXU (operands may be bf16); f32 accumulation.
    z = jnp.dot(pooled.astype(w_ref.dtype), w_ref[...],
                preferred_element_type=jnp.float32)                      # (tb, E)
    # L2 normalize with rsqrt (EUP slot, nearly free).
    # TODO(synk): no epsilon, matching the reference (zero-norm row -> inf/NaN).
    inv_norm = lax.rsqrt(jnp.sum(z * z, axis=-1, keepdims=True))         # (tb, 1)
    z_ref[...] = (z * inv_norm).astype(z_ref.dtype)


def _encode_side(feat, w, *, mxu_dtype, emb_dtype, max_batch_tile, vmem_limit):
    batch, seq, hidden = feat.shape
    emb = w.shape[1]
    align = 16 if (feat.dtype == jnp.bfloat16 or
                   jnp.dtype(emb_dtype) == jnp.bfloat16) else 8
    bytes_per_row = (seq * hidden * feat.dtype.itemsize
                     + emb * jnp.dtype(emb_dtype).itemsize)
    tb = _pick_tile(batch, bytes_per_row, align=align, max_tile=max_batch_tile)
    grid = (batch // tb,)
    return pl.pallas_call(
        _encode_kernel,
        out_shape=jax.ShapeDtypeStruct((batch, emb), emb_dtype),
        grid=grid,
        in_specs=[
            pl.BlockSpec((tb, seq, hidden), lambda i: (i, 0, 0)),  # pipelined feature tiles
            pl.BlockSpec((hidden, emb), lambda i: (0, 0)),         # weight stays resident
        ],
        out_specs=pl.BlockSpec((tb, emb), lambda i: (i, 0)),
        compiler_params=pltpu.CompilerParams(
            dimension_semantics=("parallel",),
            vmem_limit_bytes=vmem_limit,
        ),
    )(feat, w.astype(mxu_dtype))


# ---------- stage 2: logits = (za @ zb.T) * exp(temperature), tiled over (rows, cols) ---------- #
def _logits_kernel(scale_ref, za_ref, zb_ref, out_ref):
    # scale_ref: (1, 1) f32 in SMEM (exp(temperature))
    # za_ref: (tm, E), zb_ref: (tn, E), out_ref: (tm, tn) f32
    acc = lax.dot_general(za_ref[...], zb_ref[...], (((1,), (1,)), ((), ())),
                          preferred_element_type=jnp.float32)
    # apply the logit scale AFTER the f32-accumulated matmul (bf16-embedding safe)
    out_ref[...] = acc * scale_ref[0, 0]


def _similarity(za, zb, scale, *, vmem_limit, max_row_tile=1024, max_col_tile=2048):
    batch, emb = za.shape
    align = 16 if za.dtype == jnp.bfloat16 else 8
    tn = _pick_col_tile(batch, max_col_tile)
    bytes_per_row = tn * 4 + emb * za.dtype.itemsize     # output row + za row
    tm = _pick_tile(batch, bytes_per_row, align=align, max_tile=max_row_tile)
    grid = (batch // tm, batch // tn)
    return pl.pallas_call(
        _logits_kernel,
        out_shape=jax.ShapeDtypeStruct((batch, batch), jnp.float32),
        grid=grid,
        in_specs=[
            pl.BlockSpec(memory_space=pltpu.MemorySpace.SMEM),      # scalar logit scale
            pl.BlockSpec((tm, emb), lambda i, j: (i, 0)),
            pl.BlockSpec((tn, emb), lambda i, j: (j, 0)),
        ],
        out_specs=pl.BlockSpec((tm, tn), lambda i, j: (i, j)),      # lane-dense output block
        compiler_params=pltpu.CompilerParams(
            dimension_semantics=("parallel", "parallel"),
            vmem_limit_bytes=vmem_limit,
        ),
    )(scale, za, zb)


def clip_cdr3_pair_head(a_feat, b_feat, wa, wb, temperature, *,
                        mxu_dtype=jnp.bfloat16, feat_dtype=jnp.bfloat16,
                        emb_dtype=jnp.bfloat16, max_batch_tile=1024):
    """a_feat, b_feat: (B, S, H); wa, wb: (H, E); temperature: (1,).

    Returns (B, B) f32 logits:
        normalize(mean_seq(a_feat) @ wa) @ normalize(mean_seq(b_feat) @ wb).T * exp(temperature)
    matching torch's `linearX(feat.mean(dim=1))` with nn.Linear(H, E, bias=False)
    whose weight is stored transposed as (H, E) so the op is `x @ W`.
    """
    batch = a_feat.shape[0]
    assert b_feat.shape[0] == batch
    align = 16 if (jnp.dtype(feat_dtype) == jnp.bfloat16 or
                   jnp.dtype(emb_dtype) == jnp.bfloat16) else 8

    a = a_feat.astype(feat_dtype)
    b = b_feat.astype(feat_dtype)
    pad = (-batch) % align
    if pad:
        # pad batch to a sublane multiple so the grid pipeline always engages
        # (padded rows produce NaN embeddings that are sliced away below).
        a = jnp.pad(a, ((0, pad), (0, 0), (0, 0)))
        b = jnp.pad(b, ((0, pad), (0, 0), (0, 0)))

    vmem_limit = _vmem_limit_bytes()
    za = _encode_side(a, wa, mxu_dtype=mxu_dtype, emb_dtype=emb_dtype,
                      max_batch_tile=max_batch_tile, vmem_limit=vmem_limit)
    zb = _encode_side(b, wb, mxu_dtype=mxu_dtype, emb_dtype=emb_dtype,
                      max_batch_tile=max_batch_tile, vmem_limit=vmem_limit)

    scale = jnp.exp(jnp.asarray(temperature, jnp.float32)).reshape(1, 1)
    logits = _similarity(za, zb, scale, vmem_limit=vmem_limit)
    if pad:
        logits = logits[:batch, :batch]
    return logits


# ------------------------ minimal deterministic "BERT" stub ----------------------- #
# TODO(synk): the BERT class is not provided by the module; this stand-in (token
# embedding + position embedding + one dense layer with tanh) only supplies
# deterministic (B, S, hidden) features for the CLIP head.
def bert_encoder_stub(tokens, params):
    emb = params["tok_emb"][tokens] + params["pos_emb"][None, : tokens.shape[1], :]
    return jnp.tanh(emb @ params["w1"] + params["b1"])


def init_bert_params(key, vocab, seq, hidden):
    k0, k1, k2, k3 = jax.random.split(key, 4)
    return {
        "tok_emb": jax.random.normal(k0, (vocab, hidden), jnp.float32) * 0.1,
        "pos_emb": jax.random.normal(k1, (seq, hidden), jnp.float32) * 0.1,
        "w1": jax.random.normal(k2, (hidden, hidden), jnp.float32) * 0.1,
        "b1": jax.random.normal(k3, (hidden,), jnp.float32) * 0.1,
    }


# ------------------------------------ reference ----------------------------------- #
def reference_head(a_feat, b_feat, wa, wb, temperature):
    hi = jax.lax.Precision.HIGHEST
    za = jnp.dot(jnp.mean(a_feat, axis=1), wa, precision=hi)
    zb = jnp.dot(jnp.mean(b_feat, axis=1), wb, precision=hi)
    za = za / jnp.linalg.norm(za, axis=-1, keepdims=True)
    zb = zb / jnp.linalg.norm(zb, axis=-1, keepdims=True)
    return jnp.dot(za, zb.T, precision=hi) * jnp.exp(temperature.reshape(()))


# -------------------------------------- main --------------------------------------- #
if __name__ == "__main__":
    # small but lane/sublane-aligned shapes: H and E multiples of 128
    B, S, H, E, VOCAB = 32, 8, 128, 128, 24

    key = jax.random.PRNGKey(0)
    (k_tok_a, k_tok_b, k_bert_a, k_bert_b,
     k_wa, k_wb, k_temp) = jax.random.split(key, 7)

    # token inputs (aCDR3, bCDR3) — integer amino-acid ids
    aCDR3 = jax.random.randint(k_tok_a, (B, S), 0, VOCAB)
    bCDR3 = jax.random.randint(k_tok_b, (B, S), 0, VOCAB)

    bert_a_params = init_bert_params(k_bert_a, VOCAB, S, H)
    bert_b_params = init_bert_params(k_bert_b, VOCAB, S, H)
    # nn.Linear(H, E, bias=False) weight is (E, H); stored transposed as (H, E) => x @ W
    linearA_w = jax.random.normal(k_wa, (H, E), jnp.float32) * 0.1
    linearB_w = jax.random.normal(k_wb, (H, E), jnp.float32) * 0.1
    # nn.Parameter(torch.randn(1))
    temperature = jax.random.normal(k_temp, (1,), jnp.float32)
    logit_scale = float(jnp.exp(temperature)[0])

    # encoder features (plain-JAX glue for the external BERT encoders)
    a_feat = bert_encoder_stub(aCDR3, bert_a_params)  # (B, S, H)
    b_feat = bert_encoder_stub(bCDR3, bert_b_params)  # (B, S, H)

    ref = reference_head(a_feat, b_feat, linearA_w, linearB_w, temperature)

    # 1) f32 end-to-end (tight numerical check); small max_batch_tile forces a
    #    multi-step batch grid so the pipelined / multi-block path is exercised.
    logits_f32 = clip_cdr3_pair_head(
        a_feat, b_feat, linearA_w, linearB_w, temperature,
        mxu_dtype=jnp.float32, feat_dtype=jnp.float32, emb_dtype=jnp.float32,
        max_batch_tile=8)
    logits_f32 = jax.block_until_ready(logits_f32)
    assert logits_f32.shape == (B, B)
    assert jnp.allclose(logits_f32, ref, atol=2e-3, rtol=2e-3), (logits_f32, ref)

    # 2) default path: bf16 feature streaming, bf16 MXU operands, bf16 embeddings
    #    (f32 pooling / normalize / logit accumulation).
    logits_bf16 = clip_cdr3_pair_head(a_feat, b_feat, linearA_w, linearB_w, temperature)
    logits_bf16 = jax.block_until_ready(logits_bf16)
    assert logits_bf16.shape == (B, B)
    assert jnp.allclose(logits_bf16, ref,
                        atol=0.05 * max(logit_scale, 1.0), rtol=0.05), (logits_bf16, ref)

    # 3) unaligned batch (exercises the pad-to-sublane path instead of a
    #    single full-batch block).
    Bu = 20
    ref_u = reference_head(a_feat[:Bu], b_feat[:Bu], linearA_w, linearB_w, temperature)
    logits_u = clip_cdr3_pair_head(a_feat[:Bu], b_feat[:Bu],
                                   linearA_w, linearB_w, temperature)
    logits_u = jax.block_until_ready(logits_u)
    assert logits_u.shape == (Bu, Bu)
    assert jnp.all(jnp.isfinite(logits_u))
    assert jnp.allclose(logits_u, ref_u,
                        atol=0.05 * max(logit_scale, 1.0), rtol=0.05), (logits_u, ref_u)

    print("KERNEL_OK")
</pallas_src>

<mosaic_0001>
module attributes {stable_mosaic.version = 11 : i64} {
  func.func @_encode_kernel(%arg0: i32, %arg1: memref<8x8x128xf32, #tpu.memory_space<vmem>>, %arg2: memref<128x128xf32, #tpu.memory_space<vmem>>, %arg3: memref<8x128xf32, #tpu.memory_space<vmem>>) attributes {dimension_semantics = [#tpu.dimension_semantics<parallel>], iteration_bounds = array<i64: 4>, scalar_prefetch = 0 : i64, scratch_operands = 0 : i64, tpu.core_type = #tpu.core_type<tc>, window_params = [{transform_indices = @transform_0, window_bounds = array<i64: 8, 8, 128>}, {pipeline_mode = #tpu.pipeline_mode<synchronous>, transform_indices = @transform_1, window_bounds = array<i64: 128, 128>}, {transform_indices = @transform_2, window_bounds = array<i64: 8, 128>}]} {
    %c0 = arith.constant 0 : index
    %c0_0 = arith.constant 0 : index
    %c0_1 = arith.constant 0 : index
    %0 = vector.load %arg1[%c0, %c0_0, %c0_1] : memref<8x8x128xf32, #tpu.memory_space<vmem>>, vector<8x1x128xf32>
    %1 = vector.shape_cast %0 : vector<8x1x128xf32> to vector<8x128xf32>
    %c0_2 = arith.constant 0 : index
    %c1 = arith.constant 1 : index
    %c0_3 = arith.constant 0 : index
    %2 = vector.load %arg1[%c0_2, %c1, %c0_3] : memref<8x8x128xf32, #tpu.memory_space<vmem>>, vector<8x1x128xf32>
    %3 = vector.shape_cast %2 : vector<8x1x128xf32> to vector<8x128xf32>
    %4 = arith.addf %1, %3 : vector<8x128xf32>
    %c0_4 = arith.constant 0 : index
    %c2 = arith.constant 2 : index
    %c0_5 = arith.constant 0 : index
    %5 = vector.load %arg1[%c0_4, %c2, %c0_5] : memref<8x8x128xf32, #tpu.memory_space<vmem>>, vector<8x1x128xf32>
    %6 = vector.shape_cast %5 : vector<8x1x128xf32> to vector<8x128xf32>
    %7 = arith.addf %4, %6 : vector<8x128xf32>
    %c0_6 = arith.constant 0 : index
    %c3 = arith.constant 3 : index
    %c0_7 = arith.constant 0 : index
    %8 = vector.load %arg1[%c0_6, %c3, %c0_7] : memref<8x8x128xf32, #tpu.memory_space<vmem>>, vector<8x1x128xf32>
    %9 = vector.shape_cast %8 : vector<8x1x128xf32> to vector<8x128xf32>
    %10 = arith.addf %7, %9 : vector<8x128xf32>
    %c0_8 = arith.constant 0 : index
    %c4 = arith.constant 4 : index
    %c0_9 = arith.constant 0 : index
    %11 = vector.load %arg1[%c0_8, %c4, %c0_9] : memref<8x8x128xf32, #tpu.memory_space<vmem>>, vector<8x1x128xf32>
    %12 = vector.shape_cast %11 : vector<8x1x128xf32> to vector<8x128xf32>
    %13 = arith.addf %10, %12 : vector<8x128xf32>
    %c0_10 = arith.constant 0 : index
    %c5 = arith.constant 5 : index
    %c0_11 = arith.constant 0 : index
    %14 = vector.load %arg1[%c0_10, %c5, %c0_11] : memref<8x8x128xf32, #tpu.memory_space<vmem>>, vector<8x1x128xf32>
    %15 = vector.shape_cast %14 : vector<8x1x128xf32> to vector<8x128xf32>
    %16 = arith.addf %13, %15 : vector<8x128xf32>
    %c0_12 = arith.constant 0 : index
    %c6 = arith.constant 6 : index
    %c0_13 = arith.constant 0 : index
    %17 = vector.load %arg1[%c0_12, %c6, %c0_13] : memref<8x8x128xf32, #tpu.memory_space<vmem>>, vector<8x1x128xf32>
    %18 = vector.shape_cast %17 : vector<8x1x128xf32> to vector<8x128xf32>
    %19 = arith.addf %16, %18 : vector<8x128xf32>
    %c0_14 = arith.constant 0 : index
    %c7 = arith.constant 7 : index
    %c0_15 = arith.constant 0 : index
    %20 = vector.load %arg1[%c0_14, %c7, %c0_15] : memref<8x8x128xf32, #tpu.memory_space<vmem>>, vector<8x1x128xf32>
    %21 = vector.shape_cast %20 : vector<8x1x128xf32> to vector<8x128xf32>
    %22 = arith.addf %19, %21 : vector<8x128xf32>
    %c0_16 = arith.constant 0 : index
    %c0_17 = arith.constant 0 : index
    %23 = vector.load %arg2[%c0_16, %c0_17] : memref<128x128xf32, #tpu.memory_space<vmem>>, vector<128x128xf32>
    %cst = arith.constant dense<0.000000e+00> : vector<8x128xf32>
    %24 = tpu.matmul %22, %23, %cst {dimension_numbers = #tpu.dot_dimension_numbers<[1], [0], [0], [1], [0, 0, 1, 1], [], []>} : vector<8x128xf32>, vector<128x128xf32>, vector<8x128xf32> -> vector<8x128xf32>
    %25 = arith.mulf %24, %24 : vector<8x128xf32>
    %cst_18 = arith.constant dense<0.000000e+00> : vector<8xf32>
    %26 = vector.multi_reduction <add>, %25, %cst_18 [1] : vector<8x128xf32> to vector<8xf32>
    %27 = vector.shape_cast %26 : vector<8xf32> to vector<8x1xf32>
    %28 = math.rsqrt %27 : vector<8x1xf32>
    %29 = vector.broadcast %28 : vector<8x1xf32> to vector<8x128xf32>
    %30 = arith.mulf %24, %29 : vector<8x128xf32>
    %c0_19 = arith.constant 0 : index
    %c0_20 = arith.constant 0 : index
    %31 = vector.load %arg3[%c0_19, %c0_20] : memref<8x128xf32, #tpu.memory_space<vmem>>, vector<8x128xf32>
    tpu.vector_store %arg3[%c0_19, %c0_20], %30 {strides = array<i32>} : memref<8x128xf32, #tpu.memory_space<vmem>>, vector<8x128xf32>,
    return
  }
  func.func @transform_0(%arg0: i32) -> (i32, i32, i32) {
    %c0_i32 = arith.constant 0 : i32
    %c0_i32_0 = arith.constant 0 : i32
    %c0_i32_1 = arith.constant 0 : i32
    return %arg0, %c0_i32, %c0_i32_0 : i32, i32, i32
  }
  func.func @transform_1(%arg0: i32) -> (i32, i32) {
    %c0_i32 = arith.constant 0 : i32
    %c0_i32_0 = arith.constant 0 : i32
    %c0_i32_1 = arith.constant 0 : i32
    return %c0_i32, %c0_i32_0 : i32, i32
  }
  func.func @transform_2(%arg0: i32) -> (i32, i32) {
    %c0_i32 = arith.constant 0 : i32
    %c0_i32_0 = arith.constant 0 : i32
    return %arg0, %c0_i32 : i32, i32
  }
}

</mosaic_0001>

<bundles_post_ra>
// kernel: tpu_custom_call.1
= control target key start
LH: loop header
LB: loop body
LE: loop exit
PB: predicated region body
PF: predicated region fallthrough
CT: control target
= control target key end

     0   :  { %7 = vsyncpa [#allocation3], 0  ;;  %s916_s0 = inlined_call_operand.hbm [shape: f32[32,8,128], index: 0, kind: input, shape index: {}]   ;;  %s917_s1 = inlined_call_operand.hbm [shape: f32[128,128], index: 1, kind: input, shape index: {}]   ;;  %s918_s2 = inlined_call_operand.hbm [shape: f32[32,128], index: 2, kind: output, shape index: {}]  }
   0x1   :  { %9 = vsyncpa [#allocation3 + $0x1], 0 }
   0x2   :  { %10 = vsyncpa [#allocation6], 0 }
   0x3   :  { %11 = vsyncpa [#allocation4], 0 }
   0x4   :  { %13 = vsyncpa [#allocation4 + $0x1], 0  ;;  %s706_s9 = smov 0   ;;  %s708_s10 = smov 0  }
   0x5   :  { %s710_s11 = smov 0   ;;  %s712_s12 = smov 0  }
   0x6 LB: > { %s727_s13 = sadd.s32 4294967295, %s686_s12   ;;  %s479_s14 = sadd.s32 4294967294, %s686_s12   ;;  %s686_s12 = sphi %s712_s12, %s927_s12   ;;  %s682_s11 = sphi %s710_s11, %s926_s11   ;;  %s678_s10 = sphi %s708_s10, %s925_s10   ;;  %s674_s9 = sphi %s706_s9, %s924_s9  }
   0x7   : > { %p39_p0 = scmp.ne.s32.totalorder %s678_s10, %s674_s9  ;;  %p40_p1 = scmp.eq.s32.totalorder %s727_s13, 0 }
   0x8   : > { %p84_p2 = scmp.eq.s32.totalorder %s727_s13, 3  ;;  %p90_p3 = scmp.eq.s32.totalorder %s479_s14, 3 }
   0x9   : > { %p736_p4 = por %p40_p1, %p39_p0  ;;  %p480_p5 = scmp.ge.s32.totalorder %s686_s12, 1 }
   0xa   : > { %p741_p6 = por %p90_p3, %p39_p0  ;;  %p97_p7 = scmp.lt.s32.totalorder %s686_s12, 5 }
   0xb   : > { %s108_s19 = sshll.u32 %s917_s1, 4  ;;  %s688_s21 = smov [#allocation5]   ;;  %s109_s19 = int_to_ptr.hbm [resolvable:$true] %s108_s19 }
   0xc   : > { %p749_p8 = pnand %p480_p5, %p97_p7  ;;  %s110_s22 = sshll.u32 %s688_s21, 4  ;;  %s111_s22 = int_to_ptr.vmem [resolvable:$true] %s110_s22 }
   0xd   : > { %s758_s23 = sadd.s32 1, %s686_s12   ;;  %s689_s24 = smov 128  }
   0xe   : > { %p503_p9 = pneg %p749_p8  ;;  %s690_s25 = smov 8  }
   0xf   : > { %s23_s26 = ssub.s32 %s686_s12, %s758_s23  ;;  %s26_s27 = sadd.s32 1, %s682_s11 }
  0x10   : > { %p504_p10 = pnand %p503_p9, %p40_p1  ;;  %p24_p11 = scmp.eq.s32.totalorder %s23_s26, 0 }
  0x11   : > { %p33_p12 = scmp.ne.s32.totalorder %s682_s11, %s678_s10  ;;  %p34_p13 = scmp.eq.s32.totalorder %s686_s12, 0 }
  0x12   : > { %506 = dma.hbm_to_vmem [thread:$0]  (!%p504_p10), %s109_s19, 2048, %s111_s22, [#allocation6], %s689_s24, %s689_s24, %s690_s25  }
  0x13   : > { %s770_s28 = scalar_select %p24_p11, %s682_s11, %s26_s27  }
  0x14   : > { %p774_p0 = por %p84_p2, %p33_p12  ;;  %p516_p3 = scmp.lt.s32.totalorder %s686_s12, 4 }
  0x15   : > { %s124_s30 = sand.u32 1, %s682_s11   ;;  %s494_s3 = sshll.u32 %s686_s12, 6 }
  0x16   : > { %p35_p5 = por %p34_p13, %p33_p12  ;;  %s483_s4 = sshll.u32 %s124_s30, 6 }
  0x17   : > { %s133_s7 = scalar_lea.hbm %s916_s0, %s494_s3  ;;  %s128_s14 = scalar_lea.vmem [#allocation2], %s483_s4 }
  0x18   : > { %s134_s8 = sshll.u32 %s133_s7, 4  ;;  %s136_s17 = sshll.u32 %s128_s14, 4  ;;  %s135_s8 = int_to_ptr.hbm [resolvable:$true] %s134_s8  ;;  %s137_s17 = int_to_ptr.vmem [resolvable:$true] %s136_s17 }
  0x19   : > { %p784_p7 = pnand %p516_p3, %p35_p5  ;;  %s125_s19 = scalar_lea.sflag [#allocation3], %s124_s30 }
  0x1a   : > { %s586_s21 = sshra.s32 %s135_s8, 4  ;;  %s593_s3 = scalar_lea.hbm %s916_s0, 256  ;;  %s587_s21 = int_to_ptr.hbm [resolvable:$true] %s586_s21 }
  0x1b   : > { %s588_s22 = scalar_lea.hbm %s587_s21, 64  ;;  %p590_p9 = pneg %p784_p7 }
  0x1c   : > { %p589_p2 = scmp.ne.s32.totalorder %s587_s21, %s588_s22  ;;  %p594_p12 = scmp.lt.s32.totalorder %s587_s21, %s916_s0 }
  0x1d   : > { %p595_p13 = scmp.lt.s32.totalorder %s593_s3, %s588_s22 }
  0x1e   : > { %p591_p10 = pnand %p590_p9, %p589_p2 }
  0x1f   : > { %p596_p3 = por %p595_p13, %p594_p12 }
  0x20   : > { %p592_p11 = pneg %p591_p10 }
  0x22   : > { %p597_p5 = pnand %p596_p3, %p592_p11 }
  0x24   : > { %600 = shalt.err (!%p597_p5)
}
  0x25   : > { %510 = dma.hbm_to_vmem [thread:$0]  (!%p784_p7), %s135_s8, 1024, %s137_s17, %s125_s19, %s689_s24, %s689_s24, %s690_s25  }
  0x26   : > { %148 = sbr.rel (%p749_p8) target bundleno = 349 (0x15d), region = 28  ;;  %s804_s30 = sand.u32 (!%p749_p8), 1, %s678_s10  }
  0x27   : > { %s487_s6 = sshll.u32 (!%p749_p8), %s804_s30, 6  ;;  %s151_s7 = scalar_lea.sflag (!%p749_p8), [#allocation3], %s804_s30 }
  0x28   : > { %s808_s14 = scalar_lea.vmem (!%p749_p8), [#allocation2], %s487_s6 }
  0x2b   : > { %661 = dma.done.wait (%p736_p4), %s151_s7, 1024  }
  0x2c   : > { %663 = vsyncadd (%p736_p4), %s151_s7, 4294966272 }
  0x2d   : > { %665 = dma.done.wait (%p40_p1), [#allocation6], 2048  }
  0x2e   : > { %667 = vsyncadd (%p40_p1), [#allocation6], 4294965248  ;;  %v317_v0 = vld [vmem:[#allocation5 + $0x78] sm:$0xff]  ;;  %v316_v1 = vld [vmem:[#allocation5 + $0x70] sm:$0xff]  ;;  %vm327_vm0 = vcmask 1041409   ;;  %vm330_vm1 = vcmask 1042434  }
  0x2f   : > { %348 = vmatpush.msra.mxu0 %v317_v0  ;;  %v315_v2 = vld [vmem:[#allocation5 + $0x68] sm:$0xff]  ;;  %v314_v3 = vld [vmem:[#allocation5 + $0x60] sm:$0xff]  ;;  %v313_v4 = vld [vmem:[#allocation5 + $0x58] sm:$0xff]  ;;  %vm333_vm2 = vcmask 1043459   ;;  %vm336_vm3 = vcmask 1044484   ;;  %vm339_vm4 = vcmask 1045509  }
  0x30   : > { %v182_v5 = vld [vmem:[%s808_s14] sm:$0x1]  ;;  %v183_v6 = vld [vmem:[%s808_s14 + $0x8] sm:$0x1]  ;;  %v312_v7 = vld [vmem:[#allocation5 + $0x50] sm:$0xff]  ;;  %vm342_vm5 = vcmask 1046534  }
  0x31   : > { %349 = vmatpush.msra.mxu0 %v316_v1  ;;  %v184_v8 = vld [vmem:[%s808_s14 + $0x10] sm:$0x1]  ;;  %v185_v9 = vld [vmem:[%s808_s14 + $0x18] sm:$0x1]  ;;  %v186_v10 = vld [vmem:[%s808_s14 + $0x20] sm:$0x1] }
  0x32   : > { %v187_v11 = vld [vmem:[%s808_s14 + $0x28] sm:$0x1]  ;;  %v188_v12 = vld [vmem:[%s808_s14 + $0x30] sm:$0x1]  ;;  %v189_v13 = vld [vmem:[%s808_s14 + $0x38] sm:$0x1] }
  0x33   : > { %350 = vmatpush.msra.mxu0 %v315_v2  ;;  %v311_v14 = vld [vmem:[#allocation5 + $0x48] sm:$0xff]  ;;  %v190_v15 = vld [vmem:[%s808_s14 + $0x1] sm:$0x1]  ;;  %v192_v17 = vld [vmem:[%s808_s14 + $0x11] sm:$0x1]  ;;  %vm345_vm6 = vcmask 1047559  }
  0x34   : > { %v191_v16 = vld [vmem:[%s808_s14 + $0x9] sm:$0x1]  ;;  %v193_v18 = vld [vmem:[%s808_s14 + $0x19] sm:$0x1]  ;;  %v194_v19 = vld [vmem:[%s808_s14 + $0x21] sm:$0x1]  ;;  %v198_v21 = vadd.f32 %v190_v15, %v182_v5  ;;  %v200_v23 = vadd.f32 %v192_v17, %v184_v8 }
  0x35   : > { %351 = vmatpush.msra.mxu0 %v314_v3  ;;  %v195_v20 = vld [vmem:[%s808_s14 + $0x29] sm:$0x1]  ;;  %v199_v22 = vadd.f32 %v191_v16, %v183_v6  ;;  %v310_v24 = vld [vmem:[#allocation5 + $0x40] sm:$0xff]  ;;  %v196_v25 = vld [vmem:[%s808_s14 + $0x31] sm:$0x1]  ;;  %v201_v27 = vadd.f32 %v193_v18, %v185_v9  ;;  %v202_v28 = vadd.f32 %v194_v19, %v186_v10  ;;  %s489_s15 = sshll.u32 %s804_s30, 3 }
  0x36   : > { %v197_v26 = vld [vmem:[%s808_s14 + $0x39] sm:$0x1]  ;;  %v203_v29 = vadd.f32 %v195_v20, %v187_v11  ;;  %v206_v30 = vld [vmem:[%s808_s14 + $0x2] sm:$0x1]  ;;  %v204_v31 = vadd.f32 %v196_v25, %v188_v12  ;;  %v207_v33 = vld [vmem:[%s808_s14 + $0xa] sm:$0x1] }
  0x37   : > { %352 = vmatpush.msra.mxu0 %v313_v4  ;;  %v205_v32 = vadd.f32 %v197_v26, %v189_v13  ;;  %v208_v34 = vld [vmem:[%s808_s14 + $0x12] sm:$0x1]  ;;  %v209_v35 = vld [vmem:[%s808_s14 + $0x1a] sm:$0x1]  ;;  %v214_v36 = vadd.f32 %v206_v30, %v198_v21  ;;  %v210_v38 = vld [vmem:[%s808_s14 + $0x22] sm:$0x1]  ;;  %v215_v41 = vadd.f32 %v207_v33, %v199_v22 }
  0x38   : > { %v309_v37 = vld [vmem:[#allocation5 + $0x38] sm:$0xff]  ;;  %v211_v39 = vld [vmem:[%s808_s14 + $0x2a] sm:$0x1]  ;;  %v212_v40 = vld [vmem:[%s808_s14 + $0x32] sm:$0x1]  ;;  %v216_v42 = vadd.f32 %v208_v34, %v200_v23  ;;  %v217_v43 = vadd.f32 %v209_v35, %v201_v27  ;;  %v218_v45 = vadd.f32 %v210_v38, %v202_v28  ;;  %s491_s20 = sshll.u32 %s727_s13, 3 }
  0x39   : > { %353 = vmatpush.msra.mxu0 %v312_v7  ;;  %v213_v44 = vld [vmem:[%s808_s14 + $0x3a] sm:$0x1]  ;;  %v219_v46 = vadd.f32 %v211_v39, %v203_v29  ;;  %v220_v47 = vadd.f32 %v212_v40, %v204_v31  ;;  %v222_v48 = vld [vmem:[%s808_s14 + $0x3] sm:$0x1]  ;;  %v223_v49 = vld [vmem:[%s808_s14 + $0xb] sm:$0x1]  ;;  %s394_s8 = scalar_lea.hbm %s918_s2, %s491_s20 }
  0x3a   : > { %v308_v50 = vld [vmem:[#allocation5 + $0x30] sm:$0xff]  ;;  %v221_v51 = vadd.f32 %v213_v44, %v205_v32  ;;  %v225_v53 = vld [vmem:[%s808_s14 + $0x1b] sm:$0x1]  ;;  %v226_v54 = vld [vmem:[%s808_s14 + $0x23] sm:$0x1]  ;;  %v230_v55 = vadd.f32 %v222_v48, %v214_v36  ;;  %v231_v56 = vadd.f32 %v223_v49, %v215_v41  ;;  %s180_s17 = scalar_lea.vmem [#allocation7], %s489_s15 }
  0x3b   : > { %354 = vmatpush.msra.mxu0 %v311_v14  ;;  %v224_v52 = vld [vmem:[%s808_s14 + $0x13] sm:$0x1]  ;;  %v227_v57 = vld [vmem:[%s808_s14 + $0x2b] sm:$0x1]  ;;  %v229_v59 = vld [vmem:[%s808_s14 + $0x3b] sm:$0x1]  ;;  %v233_v61 = vadd.f32 %v225_v53, %v217_v43  ;;  %v234_v62 = vadd.f32 %v226_v54, %v218_v45 }
  0x3c   : > { %v228_v58 = vld [vmem:[%s808_s14 + $0x33] sm:$0x1]  ;;  %v232_v60 = vadd.f32 %v224_v52, %v216_v42  ;;  %v307_v63 = vld [vmem:[#allocation5 + $0x28] sm:$0xff]  ;;  %v235_v0 = vadd.f32 %v227_v57, %v219_v46  ;;  %v237_v2 = vadd.f32 %v229_v59, %v221_v51  ;;  %v238_v3 = vld [vmem:[%s808_s14 + $0x4] sm:$0x1]  ;;  %s396_s18 = sshll.u32 %s180_s17, 4  ;;  %s397_s18 = int_to_ptr.vmem [resolvable:$true] %s396_s18 }
  0x3d   : > { %355 = vmatpush.msra.mxu0 %v310_v24  ;;  %v236_v1 = vadd.f32 %v228_v58, %v220_v47  ;;  %v239_v4 = vld [vmem:[%s808_s14 + $0xc] sm:$0x1]  ;;  %v240_v5 = vld [vmem:[%s808_s14 + $0x14] sm:$0x1]  ;;  %v241_v6 = vld [vmem:[%s808_s14 + $0x1c] sm:$0x1]  ;;  %v246_v9 = vadd.f32 %v238_v3, %v230_v55 }
  0x3e   : > { %v242_v7 = vld [vmem:[%s808_s14 + $0x24] sm:$0x1]  ;;  %v243_v8 = vld [vmem:[%s808_s14 + $0x2c] sm:$0x1]  ;;  %v247_v10 = vadd.f32 %v239_v4, %v231_v56  ;;  %v248_v11 = vadd.f32 %v240_v5, %v232_v60  ;;  %v244_v13 = vld [vmem:[%s808_s14 + $0x34] sm:$0x1]  ;;  %v249_v15 = vadd.f32 %v241_v6, %v233_v61 }
  0x3f   : > { %356 = vmatpush.msra.mxu0 %v309_v37  ;;  %v306_v12 = vld [vmem:[#allocation5 + $0x20] sm:$0xff]  ;;  %v245_v14 = vld [vmem:[%s808_s14 + $0x3c] sm:$0x1]  ;;  %v250_v16 = vadd.f32 %v242_v7, %v234_v62  ;;  %v251_v17 = vadd.f32 %v243_v8, %v235_v0  ;;  %v252_v19 = vadd.f32 %v244_v13, %v236_v1  ;;  %v255_v21 = vld [vmem:[%s808_s14 + $0xd] sm:$0x1]  ;;  %s398_s19 = sshll.u32 %s394_s8, 4  ;;  %s399_s19 = int_to_ptr.hbm [resolvable:$true] %s398_s19 }
  0x40   : > { %v254_v18 = vld [vmem:[%s808_s14 + $0x5] sm:$0x1]  ;;  %v253_v20 = vadd.f32 %v245_v14, %v237_v2  ;;  %v256_v22 = vld [vmem:[%s808_s14 + $0x15] sm:$0x1]  ;;  %v257_v23 = vld [vmem:[%s808_s14 + $0x1d] sm:$0x1]  ;;  %v263_v29 = vadd.f32 %v255_v21, %v247_v10 }
  0x41   : > { %357 = vmatpush.msra.mxu0 %v308_v50  ;;  %v262_v24 = vadd.f32 %v254_v18, %v246_v9  ;;  %v305_v25 = vld [vmem:[#allocation5 + $0x18] sm:$0xff]  ;;  %v258_v26 = vld [vmem:[%s808_s14 + $0x25] sm:$0x1]  ;;  %v259_v27 = vld [vmem:[%s808_s14 + $0x2d] sm:$0x1]  ;;  %v264_v30 = vadd.f32 %v256_v22, %v248_v11  ;;  %v265_v31 = vadd.f32 %v257_v23, %v249_v15  ;;  %s384_s13 = scalar_lea.sflag [#allocation4], %s804_s30 }
  0x42   : > { %v260_v28 = vld [vmem:[%s808_s14 + $0x35] sm:$0x1]  ;;  %v261_v32 = vld [vmem:[%s808_s14 + $0x3d] sm:$0x1]  ;;  %v266_v33 = vadd.f32 %v258_v26, %v250_v16  ;;  %v267_v34 = vadd.f32 %v259_v27, %v251_v17  ;;  %v270_v36 = vld [vmem:[%s808_s14 + $0x6] sm:$0x1] }
  0x43   : > { %358 = vmatpush.msra.mxu0 %v307_v63  ;;  %v268_v35 = vadd.f32 %v260_v28, %v252_v19  ;;  %v271_v37 = vld [vmem:[%s808_s14 + $0xe] sm:$0x1]  ;;  %v304_v38 = vld [vmem:[#allocation5 + $0x10] sm:$0xff]  ;;  %v269_v39 = vadd.f32 %v261_v32, %v253_v20  ;;  %v273_v41 = vld [vmem:[%s808_s14 + $0x1e] sm:$0x1]  ;;  %v278_v43 = vadd.f32 %v270_v36, %v262_v24  ;;  %s630_s21 = sshra.s32 %s399_s19, 4  ;;  %s631_s21 = int_to_ptr.hbm [resolvable:$true] %s630_s21 }
  0x44   : > { %v272_v40 = vld [vmem:[%s808_s14 + $0x16] sm:$0x1]  ;;  %v274_v42 = vld [vmem:[%s808_s14 + $0x26] sm:$0x1]  ;;  %v279_v44 = vadd.f32 %v271_v37, %v263_v29  ;;  %v275_v45 = vld [vmem:[%s808_s14 + $0x2e] sm:$0x1]  ;;  %v281_v49 = vadd.f32 %v273_v41, %v265_v31  ;;  %p637_p7 = scmp.lt.s32.totalorder %s631_s21, %s918_s2 }
  0x45   : > { %359 = vmatpush.msra.mxu0 %v306_v12  ;;  %v276_v46 = vld [vmem:[%s808_s14 + $0x36] sm:$0x1]  ;;  %v277_v47 = vld [vmem:[%s808_s14 + $0x3e] sm:$0x1]  ;;  %v280_v48 = vadd.f32 %v272_v40, %v264_v30  ;;  %v282_v50 = vadd.f32 %v274_v42, %v266_v33  ;;  %v283_v51 = vadd.f32 %v275_v45, %v267_v34  ;;  %v286_v54 = vld [vmem:[%s808_s14 + $0x7] sm:$0x1] }
  0x46   : > { %v284_v52 = vadd.f32 %v276_v46, %v268_v35  ;;  %v285_v53 = vadd.f32 %v277_v47, %v269_v39  ;;  %v287_v55 = vld [vmem:[%s808_s14 + $0xf] sm:$0x1]  ;;  %v288_v56 = vld [vmem:[%s808_s14 + $0x17] sm:$0x1]  ;;  %v289_v57 = vld [vmem:[%s808_s14 + $0x1f] sm:$0x1]  ;;  %v294_v60 = vadd.f32 %v286_v54, %v278_v43 }
  0x47   : > { %360 = vmatpush.msra.mxu0 %v305_v25  ;;  %v290_v58 = vld [vmem:[%s808_s14 + $0x27] sm:$0x1]  ;;  %v291_v59 = vld [vmem:[%s808_s14 + $0x2f] sm:$0x1]  ;;  %v295_v61 = vadd.f32 %v287_v55, %v279_v44  ;;  %v296_v62 = vadd.f32 %v288_v56, %v280_v48  ;;  %v292_v0 = vld [vmem:[%s808_s14 + $0x37] sm:$0x1]  ;;  %v297_v2 = vadd.f32 %v289_v57, %v281_v49 }
  0x48   : > { %v303_v63 = vld [vmem:[#allocation5 + $0x8] sm:$0xff]  ;;  %v293_v1 = vld [vmem:[%s808_s14 + $0x3f] sm:$0x1]  ;;  %v298_v3 = vadd.f32 %v290_v58, %v282_v50  ;;  %v299_v4 = vadd.f32 %v291_v59, %v283_v51  ;;  %v300_v5 = vadd.f32 %v292_v0, %v284_v52  ;;  %v302_v9 = vld [vmem:[#allocation5] sm:$0xff]  ;;  %s632_s22 = scalar_lea.hbm %s631_s21, 8  ;;  %s636_s3 = scalar_lea.hbm %s918_s2, 32 }
  0x49   : > { %361 = vmatpush.msra.mxu0 %v304_v38  ;;  %v301_v6 = vadd.f32 %v293_v1, %v285_v53  ;;  %v326_v7 = vrot.slane %v295_v61, 7  ;;  %v329_v8 = vrot.slane %v296_v62, 6  ;;  %v332_v10 = vrot.slane %v297_v2, 5  ;;  %p633_p1 = scmp.ne.s32.totalorder %s631_s21, %s632_s22  ;;  %p638_p2 = scmp.lt.s32.totalorder %s636_s3, %s632_s22 }
  0x4a   : > { %v335_v11 = vrot.slane %v298_v3, 4  ;;  %v338_v13 = vrot.slane %v299_v4, 3  ;;  %v341_v15 = vrot.slane %v300_v5, 2 }
  0x4b   : > { %362 = vmatpush.msra.mxu0 %v303_v63  ;;  %v328_v12 = vsel %vm327_vm0, %v326_v7, %v294_v60  ;;  %v344_v17 = vrot.slane %v301_v6, 1  ;;  %p634_p4 = pnand %p633_p1, %p774_p0  ;;  %p639_p9 = por %p638_p2, %p637_p7 }
  0x4c   : > { %v331_v14 = vsel %vm330_vm1, %v329_v8, %v328_v12 }
  0x4d   : > { %363 = vmatpush.msra.mxu0 %v302_v9  ;;  %v334_v16 = vsel %vm333_vm2, %v332_v10, %v331_v14  ;;  %p635_p8 = pneg %p634_p4 }
  0x4e   : > { %v337_v18 = vsel %vm336_vm3, %v335_v11, %v334_v16 }
  0x4f   : > { %v340_v19 = vsel %vm339_vm4, %v338_v13, %v337_v18  ;;  %p640_p10 = pnand %p639_p9, %p635_p8 }
  0x50   : > { %v343_v20 = vsel %vm342_vm5, %v341_v15, %v340_v19 }
  0x51   : > { %v346_v21 = vsel %vm345_vm6, %v344_v17, %v343_v20 }
  0x52   : > { %364 = vmatmul.f32.vlgmr.msra.gmra.mxu0 %v346_v21 }
  0xcf   : > { %v365_v22 = vpop.f32.mrf.mxu0 }
  0xd0   : > { %v368_v23 = vmul.f32 %v365_v22, %v365_v22 }
  0xd2   : > { %369 = vadd.xlane.f32.xlu0 %v368_v23 }
 0x145   : > { %v370_v24 = vpop.xlane.xlu0 %369 }
 0x146   : > { %554 = vrsqrt.f32 %v370_v24  ;;  %vm377_vm8 = vweird.f32 %v370_v24 }
 0x14c   : > { %v555_v25 = vpop.eup %554 }
 0x14d   : > { %v372_v26 = vmul.f32 %v555_v25, %v370_v24  ;;  %vm378_vm7 = vweird.f32 %v555_v25 }
 0x14e   : > { %vm379_vm9 = vmor %vm377_vm8, %vm378_vm7 }
 0x14f   : > { %v373_v27 = vmul.f32 %v555_v25, %v372_v26 }
 0x151   : > { %v374_v28 = vmul.f32 0.5, %v373_v27 }
 0x153   : > { %v375_v29 = vsub.f32 1.5, %v374_v28 }
 0x155   : > { %v376_v30 = vmul.f32 %v555_v25, %v375_v29 }
 0x157   : > { %v380_v31 = vsel %vm379_vm9, %v555_v25, %v376_v30 }
 0x158   : > { %v381_v32 = vmul.f32 %v380_v31, %v365_v22 }
 0x15a   : > { %382 = vst [vmem:[%s180_s17] sm:$0xff] %v381_v32 }
 0x15b   : > { %643 = shalt.err (!%p640_p10)
}
 0x15c   : > { %501 = dma.vmem_to_hbm [thread:$0]  (%p774_p0), %s397_s18, 128, %s399_s19, %s384_s13  }
 0x15d PF: > { %p518_p11 = scmp.ge.s32.totalorder %s686_s12, 2  ;;  %s410_s30 = sand.u32 1, %s674_s9  }
 0x15e   : > { %s411_s6 = scalar_lea.sflag [#allocation4], %s410_s30 }
 0x15f   : > { %p512_p12 = pnand %p518_p11, %p741_p6 }
 0x161   : > { %p513_p13 = pneg %p512_p12 }
 0x163   : > { %669 = dma.done.wait (%p513_p13), %s411_s6, 128  }
 0x164   : > { %671 = vsyncadd (%p513_p13), %s411_s6, 4294967168  ;;  %p16_p3 = scmp.ge.s32.totalorder %s758_s23, 6   ;;  %s924_s9 = smov %s678_s10 }
 0x165   : > { %s925_s10 = smov %s682_s11  ;;  %s926_s11 = smov %s770_s28 }
 0x166   : > { %s927_s12 = smov %s758_s23  ;;  %18 = sbr.rel (!%p16_p3) target bundleno = 6 (0x6), region = 77 }
 0x16b   :  { %417 = vsyncpa [#allocation3], 1 }
 0x16c   :  { %419 = vsyncpa [#allocation3 + $0x1], 1 }
 0x16d   :  { %420 = vsyncpa [#allocation6], 1 }
 0x16e   :  { %421 = vsyncpa [#allocation4], 1 }
 0x16f   :  { %423 = vsyncpa [#allocation4 + $0x1], 1 }

</bundles_post_ra>
